<compile_context>
chip_gen: v5e
topology: v5e:2x2
jax: 0.10.0
libtpu: 0.0.40
codegen_flags: <defaults>
</compile_context>

<pallas_src>
import functools

import jax
import jax.numpy as jnp
from jax.experimental import pallas as pl
from jax.experimental.pallas import tpu as pltpu


def _round_up(x, m):
    return (x + m - 1) // m * m


def _pick_token_tile(t):
    # Multiple of 256 for large problems (feeds the MXU M dim and gives >=2
    # tiles for pipelining / 2-TC split); multiple of 8 otherwise.
    if t >= 256:
        return 256
    return _round_up(t, 8)


def _pick_ff_tile(d_ff, d_model, itemsize):
    # d_ff tile must be a multiple of 128 (lane dim of the wi tile / sublane
    # dim of the wo tile) or cover the whole d_ff.  Keep double-buffered
    # weight slices (2 weights * 2 buffers * tf * D) under ~24 MiB.
    if d_ff % 256 != 0:
        return d_ff
    budget = 24 * 1024 * 1024
    for cand in (4096, 2048, 1024, 512, 256):
        if d_ff % cand == 0 and 4 * cand * d_model * itemsize <= budget:
            return cand
    return 256


def _decoder_ff_kernel(x_ref, lnw_ref, wi_ref, wo_ref, o_ref,
                       xn_ref, acc_ref, *, eps):
    # Grid: (token_tiles [parallel], d_ff_tiles [arbitrary/reduction]).
    # x_ref:  (TM, D)        token tile of decoder_hidden_states
    # lnw_ref:(1, D)         RMSNorm scale
    # wi_ref: (D, TF)        slice of wi^T along d_ff
    # wo_ref: (TF, D)        slice of wo^T along d_ff
    # o_ref:  (TM, D)        output tile (residual added)
    # xn_ref: (TM, D)        cached normalized activations (compute dtype)
    # acc_ref:(TM, D) f32    residual + partial FF output accumulator
    j = pl.program_id(1)

    @pl.when(j == 0)
    def _():
        x = x_ref[...].astype(jnp.float32)
        # --- T5-style RMSNorm (no mean subtraction, no bias), f32 stats ---
        var = jnp.mean(x * x, axis=-1, keepdims=True)
        xn = x * jax.lax.rsqrt(var + eps)
        xn = lnw_ref[...].astype(jnp.float32) * xn
        xn_ref[...] = xn.astype(xn_ref.dtype)   # feed MXU in native dtype
        acc_ref[...] = x                        # residual (added in f32)

    # --- wi slice -> relu -> wo slice, accumulate in f32 -------------------
    # ReLU commutes with the d_ff split (applied per-slice before wo).
    h = jnp.dot(xn_ref[...], wi_ref[...], preferred_element_type=jnp.float32)
    h = jnp.maximum(h, 0.0)
    # TODO(synk): dropout between wi and wo is a no-op in eval mode; omitted.
    acc_ref[...] += jnp.dot(h.astype(wo_ref.dtype), wo_ref[...],
                            preferred_element_type=jnp.float32)

    @pl.when(j == pl.num_programs(1) - 1)
    def _():
        # Residual is accumulated in f32 and cast once at the end; for
        # half-precision inputs this differs (favorably) from PyTorch's
        # cast-then-add by <1 ulp of the storage dtype.
        o_ref[...] = acc_ref[...].astype(o_ref.dtype)


def decoder_ff_block(decoder_hidden_states, ln_weight, wi_t, wo_t,
                     *, eps=1e-6, token_tile=None, ff_tile=None):
    """Fused RMSNorm + FF + residual.  decoder_hidden_states: (B, S, D)."""
    B, S, D = decoder_hidden_states.shape
    d_ff = wi_t.shape[1]
    T = B * S
    out_dtype = decoder_hidden_states.dtype
    compute_dtype = wi_t.dtype
    w_itemsize = jnp.dtype(compute_dtype).itemsize

    tm = token_tile if token_tile is not None else _pick_token_tile(T)
    tf = ff_tile if ff_tile is not None else _pick_ff_tile(d_ff, D, w_itemsize)
    assert d_ff % tf == 0, "d_ff must be divisible by ff_tile"

    # Pad the token axis so any batch*seq works (padded rows just flow through
    # the FF path and are sliced off afterwards).
    t_pad = _round_up(T, tm)
    x2d = decoder_hidden_states.reshape(T, D)
    if t_pad != T:
        x2d = jnp.pad(x2d, ((0, t_pad - T), (0, 0)))
    lnw2d = ln_weight.reshape(1, D)

    n_i = t_pad // tm
    n_j = d_ff // tf

    itemsize = jnp.dtype(x2d.dtype).itemsize
    cost = pl.CostEstimate(
        flops=4 * t_pad * D * d_ff,              # two matmuls
        transcendentals=t_pad,                   # one rsqrt per token
        bytes_accessed=(2 * t_pad * D * itemsize
                        + n_i * 2 * D * d_ff * w_itemsize),
    )

    out2d = pl.pallas_call(
        functools.partial(_decoder_ff_kernel, eps=eps),
        out_shape=jax.ShapeDtypeStruct((t_pad, D), out_dtype),
        grid_spec=pltpu.PrefetchScalarGridSpec(
            num_scalar_prefetch=0,
            grid=(n_i, n_j),
            in_specs=[
                pl.BlockSpec((tm, D), lambda i, j: (i, 0)),    # x tile
                pl.BlockSpec((1, D), lambda i, j: (0, 0)),     # ln weight
                pl.BlockSpec((D, tf), lambda i, j: (0, j)),    # wi^T slice
                pl.BlockSpec((tf, D), lambda i, j: (j, 0)),    # wo^T slice
            ],
            out_specs=pl.BlockSpec((tm, D), lambda i, j: (i, 0)),
            scratch_shapes=[
                pltpu.VMEM((tm, D), compute_dtype),   # cached RMSNorm output
                pltpu.VMEM((tm, D), jnp.float32),     # residual + accumulator
            ],
        ),
        compiler_params=pltpu.CompilerParams(
            dimension_semantics=("parallel", "arbitrary")),
        cost_estimate=cost,
    )(x2d, lnw2d, wi_t, wo_t)

    if t_pad != T:
        out2d = out2d[:T]
    return out2d.reshape(B, S, D)


def decoder_ff_pipe_forward(encoder_hidden_states, encoder_position_bias,
                            decoder_hidden_states,
                            encoder_extended_attention_mask,
                            decoder_extended_attention_mask,
                            decoder_position_bias,
                            params, *, eps=1e-6):
    """Mirrors DecoderFFPipe.forward: only decoder_hidden_states is updated."""
    new_dec = decoder_ff_block(decoder_hidden_states,
                               params["ln_weight"],
                               params["wi_t"],
                               params["wo_t"],
                               eps=eps)
    return (encoder_hidden_states, encoder_position_bias, new_dec,
            encoder_extended_attention_mask,
            decoder_extended_attention_mask, decoder_position_bias)


if __name__ == "__main__":
    # Small config consistent with SwitchTransformersConfig fields used here.
    batch, seq, d_model, d_ff, n_heads = 2, 8, 32, 64, 4
    eps = 1e-6

    key = jax.random.PRNGKey(0)
    k_enc, k_epb, k_dec, k_wi, k_wo = jax.random.split(key, 5)

    # Deterministic synthetic parameters (shapes per module __init__):
    #   layer_norm.weight: (d_model,)  (init ones in the module)
    #   mlp.wi.weight:     (d_ff, d_model) -> stored transposed (d_model, d_ff)
    #   mlp.wo.weight:     (d_model, d_ff) -> stored transposed (d_ff, d_model)
    params = {
        "ln_weight": jnp.ones((d_model,), jnp.float32),
        "wi_t": (jax.random.normal(k_wi, (d_model, d_ff), jnp.float32)
                 * (d_model ** -0.5)),
        "wo_t": (jax.random.normal(k_wo, (d_ff, d_model), jnp.float32)
                 * (d_ff ** -0.5)),
    }

    # Inputs (pipe-style tuple args).
    encoder_hidden_states = jax.random.normal(
        k_enc, (batch, seq, d_model), jnp.float32)
    decoder_hidden_states = jax.random.normal(
        k_dec, (batch, seq, d_model), jnp.float32)
    encoder_position_bias = jax.random.normal(
        k_epb, (batch, n_heads, seq, seq), jnp.float32)
    decoder_position_bias = jnp.zeros((batch, n_heads, seq, seq), jnp.float32)
    encoder_extended_attention_mask = jnp.zeros(
        (batch, 1, 1, seq), jnp.float32)
    decoder_extended_attention_mask = jnp.zeros(
        (batch, 1, seq, seq), jnp.float32)

    outputs = decoder_ff_pipe_forward(
        encoder_hidden_states, encoder_position_bias, decoder_hidden_states,
        encoder_extended_attention_mask, decoder_extended_attention_mask,
        decoder_position_bias, params, eps=eps)
    outputs = jax.block_until_ready(outputs)

    # Reference check in plain JAX (same math, high-precision matmuls).
    x = decoder_hidden_states.astype(jnp.float32)
    var = jnp.mean(x * x, axis=-1, keepdims=True)
    xn = params["ln_weight"] * (x * jax.lax.rsqrt(var + eps))
    hp = jax.lax.Precision.HIGHEST
    h = jnp.maximum(jnp.dot(xn, params["wi_t"], precision=hp), 0.0)
    ref = x + jnp.dot(h, params["wo_t"], precision=hp)

    assert outputs[0].shape == encoder_hidden_states.shape
    assert outputs[2].shape == decoder_hidden_states.shape
    err = jnp.max(jnp.abs(outputs[2] - ref))
    assert jnp.allclose(outputs[2], ref, atol=2e-2, rtol=2e-2), (
        f"mismatch, max abs err={err}")

    print("KERNEL_OK")
</pallas_src>

<mosaic_0001>
module attributes {stable_mosaic.version = 11 : i64} {
  func.func @_decoder_ff_kernel(%arg0: i32, %arg1: i32, %arg2: memref<16x32xf32, #tpu.memory_space<vmem>>, %arg3: memref<1x32xf32, #tpu.memory_space<vmem>>, %arg4: memref<32x64xf32, #tpu.memory_space<vmem>>, %arg5: memref<64x32xf32, #tpu.memory_space<vmem>>, %arg6: memref<16x32xf32, #tpu.memory_space<vmem>>, %arg7: memref<16x32xf32, #tpu.memory_space<vmem>>, %arg8: memref<16x32xf32, #tpu.memory_space<vmem>>) attributes {dimension_semantics = [#tpu.dimension_semantics<parallel>, #tpu.dimension_semantics<arbitrary>], iteration_bounds = array<i64: 1, 1>, scalar_prefetch = 0 : i64, scratch_operands = 2 : i64, tpu.core_type = #tpu.core_type<tc>, window_params = [{transform_indices = @transform_0, window_bounds = array<i64: 16, 32>}, {pipeline_mode = #tpu.pipeline_mode<synchronous>, transform_indices = @transform_1, window_bounds = array<i64: 1, 32>}, {transform_indices = @transform_2, window_bounds = array<i64: 32, 64>}, {transform_indices = @transform_3, window_bounds = array<i64: 64, 32>}, {transform_indices = @transform_4, window_bounds = array<i64: 16, 32>}]} {
    %c0_i32 = arith.constant 0 : i32
    %0 = arith.cmpi eq, %arg1, %c0_i32 : i32
    %1 = arith.extui %0 : i1 to i32
    %c0_i32_0 = arith.constant 0 : i32
    %2 = arith.cmpi ne, %1, %c0_i32_0 : i32
    scf.if %2 {
      %c0_14 = arith.constant 0 : index
      %c0_15 = arith.constant 0 : index
      %16 = vector.load %arg2[%c0_14, %c0_15] : memref<16x32xf32, #tpu.memory_space<vmem>>, vector<16x32xf32>
      %17 = arith.mulf %16, %16 : vector<16x32xf32>
      %cst_16 = arith.constant dense<0.000000e+00> : vector<16xf32>
      %18 = vector.multi_reduction <add>, %17, %cst_16 [1] : vector<16x32xf32> to vector<16xf32>
      %19 = vector.shape_cast %18 : vector<16xf32> to vector<16x1xf32>
      %cst_17 = arith.constant 3.200000e+01 : f32
      %20 = vector.broadcast %cst_17 : f32 to vector<16x1xf32>
      %21 = arith.divf %19, %20 : vector<16x1xf32>
      %cst_18 = arith.constant 9.99999997E-7 : f32
      %22 = vector.broadcast %cst_18 : f32 to vector<16x1xf32>
      %23 = arith.addf %21, %22 : vector<16x1xf32>
      %24 = math.rsqrt %23 : vector<16x1xf32>
      %25 = vector.broadcast %24 : vector<16x1xf32> to vector<16x32xf32>
      %26 = arith.mulf %16, %25 : vector<16x32xf32>
      %c0_19 = arith.constant 0 : index
      %c0_20 = arith.constant 0 : index
      %27 = vector.load %arg3[%c0_19, %c0_20] : memref<1x32xf32, #tpu.memory_space<vmem>>, vector<1x32xf32>
      %28 = vector.broadcast %27 : vector<1x32xf32> to vector<16x32xf32>
      %29 = arith.mulf %28, %26 : vector<16x32xf32>
      %c0_21 = arith.constant 0 : index
      %c0_22 = arith.constant 0 : index
      %30 = vector.load %arg7[%c0_21, %c0_22] : memref<16x32xf32, #tpu.memory_space<vmem>>, vector<16x32xf32>
      tpu.vector_store %arg7[%c0_21, %c0_22], %29 {strides = array<i32>} : memref<16x32xf32, #tpu.memory_space<vmem>>, vector<16x32xf32>,
      %c0_23 = arith.constant 0 : index
      %c0_24 = arith.constant 0 : index
      %31 = vector.load %arg8[%c0_23, %c0_24] : memref<16x32xf32, #tpu.memory_space<vmem>>, vector<16x32xf32>
      tpu.vector_store %arg8[%c0_23, %c0_24], %16 {strides = array<i32>} : memref<16x32xf32, #tpu.memory_space<vmem>>, vector<16x32xf32>,
    } else {
    }
    %c0 = arith.constant 0 : index
    %c0_1 = arith.constant 0 : index
    %3 = vector.load %arg7[%c0, %c0_1] : memref<16x32xf32, #tpu.memory_space<vmem>>, vector<16x32xf32>
    %c0_2 = arith.constant 0 : index
    %c0_3 = arith.constant 0 : index
    %4 = vector.load %arg4[%c0_2, %c0_3] : memref<32x64xf32, #tpu.memory_space<vmem>>, vector<32x64xf32>
    %cst = arith.constant dense<0.000000e+00> : vector<16x64xf32>
    %5 = tpu.matmul %3, %4, %cst {dimension_numbers = #tpu.dot_dimension_numbers<[1], [0], [0], [1], [0, 0, 1, 1], [], []>} : vector<16x32xf32>, vector<32x64xf32>, vector<16x64xf32> -> vector<16x64xf32>
    %cst_4 = arith.constant 0.000000e+00 : f32
    %6 = vector.broadcast %cst_4 : f32 to vector<16x64xf32>
    %7 = arith.maximumf %5, %6 : vector<16x64xf32>
    %c0_5 = arith.constant 0 : index
    %c0_6 = arith.constant 0 : index
    %8 = vector.load %arg8[%c0_5, %c0_6] : memref<16x32xf32, #tpu.memory_space<vmem>>, vector<16x32xf32>
    %c0_7 = arith.constant 0 : index
    %c0_8 = arith.constant 0 : index
    %9 = vector.load %arg5[%c0_7, %c0_8] : memref<64x32xf32, #tpu.memory_space<vmem>>, vector<64x32xf32>
    %cst_9 = arith.constant dense<0.000000e+00> : vector<16x32xf32>
    %10 = tpu.matmul %7, %9, %cst_9 {dimension_numbers = #tpu.dot_dimension_numbers<[1], [0], [0], [1], [0, 0, 1, 1], [], []>} : vector<16x64xf32>, vector<64x32xf32>, vector<16x32xf32> -> vector<16x32xf32>
    %11 = arith.addf %8, %10 : vector<16x32xf32>
    %c0_10 = arith.constant 0 : index
    %c0_11 = arith.constant 0 : index
    %12 = vector.load %arg8[%c0_10, %c0_11] : memref<16x32xf32, #tpu.memory_space<vmem>>, vector<16x32xf32>
    tpu.vector_store %arg8[%c0_10, %c0_11], %11 {strides = array<i32>} : memref<16x32xf32, #tpu.memory_space<vmem>>, vector<16x32xf32>,
    %c0_i32_12 = arith.constant 0 : i32
    %13 = arith.cmpi eq, %arg1, %c0_i32_12 : i32
    %14 = arith.extui %13 : i1 to i32
    %c0_i32_13 = arith.constant 0 : i32
    %15 = arith.cmpi ne, %14, %c0_i32_13 : i32
    scf.if %15 {
      %c0_14 = arith.constant 0 : index
      %c0_15 = arith.constant 0 : index
      %16 = vector.load %arg8[%c0_14, %c0_15] : memref<16x32xf32, #tpu.memory_space<vmem>>, vector<16x32xf32>
      %c0_16 = arith.constant 0 : index
      %c0_17 = arith.constant 0 : index
      %17 = vector.load %arg6[%c0_16, %c0_17] : memref<16x32xf32, #tpu.memory_space<vmem>>, vector<16x32xf32>
      tpu.vector_store %arg6[%c0_16, %c0_17], %16 {strides = array<i32>} : memref<16x32xf32, #tpu.memory_space<vmem>>, vector<16x32xf32>,
    } else {
    }
    return
  }
  func.func @transform_0(%arg0: i32, %arg1: i32) -> (i32, i32) {
    %c0_i32 = arith.constant 0 : i32
    %c0_i32_0 = arith.constant 0 : i32
    return %arg0, %c0_i32 : i32, i32
  }
  func.func @transform_1(%arg0: i32, %arg1: i32) -> (i32, i32) {
    %c0_i32 = arith.constant 0 : i32
    %c0_i32_0 = arith.constant 0 : i32
    %c0_i32_1 = arith.constant 0 : i32
    return %c0_i32, %c0_i32_0 : i32, i32
  }
  func.func @transform_2(%arg0: i32, %arg1: i32) -> (i32, i32) {
    %c0_i32 = arith.constant 0 : i32
    %c0_i32_0 = arith.constant 0 : i32
    return %c0_i32, %arg1 : i32, i32
  }
  func.func @transform_3(%arg0: i32, %arg1: i32) -> (i32, i32) {
    %c0_i32 = arith.constant 0 : i32
    %c0_i32_0 = arith.constant 0 : i32
    return %arg1, %c0_i32 : i32, i32
  }
  func.func @transform_4(%arg0: i32, %arg1: i32) -> (i32, i32) {
    %c0_i32 = arith.constant 0 : i32
    %c0_i32_0 = arith.constant 0 : i32
    return %arg0, %c0_i32 : i32, i32
  }
}

</mosaic_0001>

<bundles_post_ra>
// kernel: tpu_custom_call.1
= control target key start
LH: loop header
LB: loop body
LE: loop exit
PB: predicated region body
PF: predicated region fallthrough
CT: control target
= control target key end

     0   :  { %vm26_vm0 = vcmask 261120   ;;  %s337_s0 = inlined_call_operand.vmem [shape: f32[16,32], index: 0, kind: input, shape index: {}]   ;;  %s338_s1 = inlined_call_operand.vmem [shape: f32[1,32], index: 1, kind: input, shape index: {}]   ;;  %s339_s2 = inlined_call_operand.vmem [shape: f32[32,64], index: 2, kind: input, shape index: {}]   ;;  %s340_s3 = inlined_call_operand.vmem [shape: f32[64,32], index: 3, kind: input, shape index: {}]   ;;  %s341_s4 = inlined_call_operand.hbm [shape: f32[16,32], index: 4, kind: output, shape index: {}]  }
   0x1   :  { %v268_v0 = vld [vmem:[%s337_s0 + $0x8] sm:$0xff]  ;;  %v277_v2 = vld [vmem:[%s337_s0] sm:$0xff] }
   0x2   :  { %v25_v1 = vmul.f32 %v268_v0, %v268_v0  ;;  %75 = vst.msk [vmem:[#allocation3 + $0x8] sm:$0xff] %vm26_vm0, %v268_v0 }
   0x3   :  { %9 = vsyncpa [#allocation5], 0  ;;  %74 = vst.msk [vmem:[#allocation3] sm:$0xff] %vm26_vm0, %v277_v2  ;;  %v24_v4 = vmul.f32 %v277_v2, %v277_v2  ;;  %v236_v6 = vmov 32.0   ;;  %v81_v12 = vld [vmem:[%s339_s2 + $0x18] sm:$0xff]  ;;  %v80_v13 = vld [vmem:[%s339_s2 + $0x10] sm:$0xff] }
   0x4   :  { %v30_v3 = vsel %vm26_vm0, %v25_v1, 0.0  ;;  %204 = vrcp.f32 %v236_v6  ;;  %187 = vmatpush.msra.mxu3 %v81_v12  ;;  %101 = vmatpush.msra.mxu0 %v81_v12  ;;  %v79_v15 = vld [vmem:[%s339_s2 + $0x8] sm:$0xff]  ;;  %v78_v18 = vld [vmem:[%s339_s2] sm:$0xff]  ;;  %v123_v24 = vld [vmem:[%s340_s3 + $0x38] sm:$0xff]  ;;  %vm124_vm8 = vcmask 523264   ;;  %s171_s0 = sshll.u32 %s341_s4, 4  ;;  %s172_s0 = int_to_ptr.hbm [resolvable:$true] %s171_s0 }
   0x5   :  { %31 = vadd.xlane.f32.xlu0 %v30_v3  ;;  %v27_v5 = vsel %vm26_vm0, %v24_v4, 0.0  ;;  %v122_v25 = vld [vmem:[%s340_s3 + $0x30] sm:$0xff]  ;;  %191 = vmatpush.msra.mxu2 %v123_v24  ;;  %v121_v27 = vld [vmem:[%s340_s3 + $0x28] sm:$0xff]  ;;  %v120_v29 = vld [vmem:[%s340_s3 + $0x20] sm:$0xff]  ;;  %s238_s19 = smov 128   ;;  %s239_s20 = smov 8  }
   0x6   :  { %188 = vmatpush.msra.mxu3 %v80_v13  ;;  %102 = vmatpush.msra.mxu0 %v80_v13  ;;  %v119_v31 = vld [vmem:[%s340_s3 + $0x18] sm:$0xff]  ;;  %v118_v34 = vld [vmem:[%s340_s3 + $0x10] sm:$0xff]  ;;  %v203_v37 = vld [vmem:[%s338_s1] ss:$0 sm:$0xff] }
   0x7   :  { %139 = vmatpush.msra.mxu1 %v123_v24  ;;  %192 = vmatpush.msra.mxu2 %v122_v25  ;;  %v117_v50 = vld [vmem:[%s340_s3 + $0x8] sm:$0xff]  ;;  %v116_v51 = vld [vmem:[%s340_s3] sm:$0xff]  ;;  %s237_s3 = smov [#allocation4]  }
   0x8   :  { %189 = vmatpush.msra.mxu3 %v79_v15  ;;  %103 = vmatpush.msra.mxu0 %v79_v15  ;;  %s169_s16 = sshll.u32 %s237_s3, 4  ;;  %s170_s16 = int_to_ptr.vmem [resolvable:$true] %s169_s16 }
   0x9   :  { %140 = vmatpush.msra.mxu1 %v122_v25  ;;  %193 = vmatpush.msra.mxu2 %v121_v27  ;;  %v115_v59 = vld [vmem:[#allocation3 + $0x8] sm:$0xff] }
   0xa   :  { %v205_v7 = vpop.eup %204  ;;  %190 = vmatpush.msra.mxu3 %v78_v18  ;;  %104 = vmatpush.msra.mxu0 %v78_v18  ;;  %v114_v56 = vld [vmem:[#allocation3] sm:$0xff] }
   0xb   :  { %v34_v8 = vmul.f32 32.0, %v205_v7  ;;  %vm38_vm1 = vweird.f32 %v205_v7  ;;  %141 = vmatpush.msra.mxu1 %v121_v27  ;;  %194 = vmatpush.msra.mxu2 %v120_v29 }
   0xd   :  { %28 = vadd.xlane.f32.xlu0 %v27_v5  ;;  %v35_v9 = vsub.f32 1.0, %v34_v8  ;;  %142 = vmatpush.msra.mxu1 %v120_v29 }
   0xe   :  { %195 = vmatpush.msra.mxu2 %v119_v31 }
   0xf   :  { %v36_v10 = vmul.f32 %v205_v7, %v35_v9  ;;  %143 = vmatpush.msra.mxu1 %v119_v31 }
  0x10   :  { %196 = vmatpush.msra.mxu2 %v118_v34 }
  0x11   :  { %v37_v11 = vadd.f32 %v205_v7, %v36_v10  ;;  %144 = vmatpush.msra.mxu1 %v118_v34 }
  0x12   :  { %197 = vmatpush.msra.mxu2 %v117_v50 }
  0x13   :  { %v39_v14 = vsel %vm38_vm1, %v205_v7, %v37_v11  ;;  %145 = vmatpush.msra.mxu1 %v117_v50 }
  0x14   :  { %198 = vmatpush.msra.mxu2 %v116_v51 }
  0x15   :  { %146 = vmatpush.msra.mxu1 %v116_v51 }
  0x78   :  { %v32_v16 = vpop.xlane.xlu0 %31 }
  0x79   :  { %v41_v17 = vmul.f32 %v39_v14, %v32_v16 }
  0x7b   :  { %v43_v19 = vadd.f32 1e-06, %v41_v17 }
  0x7d   :  { %206 = vrsqrt.f32 %v43_v19  ;;  %vm60_vm3 = vweird.f32 %v43_v19 }
  0x80   :  { %v29_v20 = vpop.xlane.xlu0 %28 }
  0x81   :  { %v40_v21 = vmul.f32 %v39_v14, %v29_v20 }
  0x83   :  { %v207_v22 = vpop.eup %206  ;;  %v42_v23 = vadd.f32 1e-06, %v40_v21 }
  0x84   :  { %v55_v26 = vmul.f32 %v207_v22, %v43_v19  ;;  %vm61_vm2 = vweird.f32 %v207_v22 }
  0x85   :  { %208 = vrsqrt.f32 %v42_v23  ;;  %vm62_vm4 = vmor %vm60_vm3, %vm61_vm2  ;;  %vm50_vm6 = vweird.f32 %v42_v23 }
  0x86   :  { %v56_v28 = vmul.f32 %v207_v22, %v55_v26 }
  0x88   :  { %v57_v30 = vmul.f32 0.5, %v56_v28 }
  0x8a   :  { %v58_v32 = vsub.f32 1.5, %v57_v30 }
  0x8b   :  { %v209_v33 = vpop.eup %208 }
  0x8c   :  { %v59_v35 = vmul.f32 %v207_v22, %v58_v32  ;;  %v45_v36 = vmul.f32 %v209_v33, %v42_v23  ;;  %vm51_vm5 = vweird.f32 %v209_v33 }
  0x8d   :  { %vm52_vm7 = vmor %vm50_vm6, %vm51_vm5 }
  0x8e   :  { %v63_v38 = vsel %vm62_vm4, %v207_v22, %v59_v35  ;;  %v46_v39 = vmul.f32 %v209_v33, %v45_v36 }
  0x8f   :  { %v65_v40 = vmul.f32 %v63_v38, %v268_v0 }
  0x90   :  { %v47_v41 = vmul.f32 0.5, %v46_v39 }
  0x91   :  { %v71_v42 = vmul.f32 %v203_v37, %v65_v40 }
  0x92   :  { %v48_v43 = vsub.f32 1.5, %v47_v41 }
  0x93   :  { %73 = vst.msk [vmem:[#allocation2 + $0x8] sm:$0xff] %vm26_vm0, %v71_v42 }
  0x94   :  { %v49_v44 = vmul.f32 %v209_v33, %v48_v43 }
  0x96   :  { %v53_v45 = vsel %vm52_vm7, %v209_v33, %v49_v44 }
  0x97   :  { %v64_v46 = vmul.f32 %v53_v45, %v277_v2 }
  0x99   :  { %v70_v47 = vmul.f32 %v203_v37, %v64_v46 }
  0x9a   :  { %v77_v48 = vld [vmem:[#allocation2 + $0x8] sm:$0xff] }
  0x9b   :  { %72 = vst.msk [vmem:[#allocation2] sm:$0xff] %vm26_vm0, %v70_v47  ;;  %184 = vmatmul.msk.f32.vlgmr.msra.gmra.mxu3 %vm26_vm0, %v77_v48 }
  0xa2   :  { %v76_v49 = vld [vmem:[#allocation2] sm:$0xff] }
  0xa3   :  { %183 = vmatmul.msk.f32.vlgmr.msra.gmra.mxu0 %vm26_vm0, %v76_v49 }
 0x11e   :  { %v109_v52 = vpop.f32.mrf.mxu3 }
 0x11f   :  { %v113_v53 = vmax.f32 %v109_v52, 0.0 }
 0x120   :  { %v106_v54 = vpop.f32.mrf.mxu0 }
 0x121   :  { %v112_v55 = vmax.f32 %v106_v54, 0.0  ;;  %186 = vmatmul.msk.f32.vlgmr.msra.gmra.mxu2 %vm124_vm8, %v113_v53 }
 0x123   :  { %185 = vmatmul.msk.f32.vlgmr.msra.gmra.mxu1 %vm124_vm8, %v112_v55 }
 0x1a0   :  { %v148_v57 = vpop.f32.mrf.mxu1 }
 0x1a1   :  { %v154_v58 = vadd.f32 %v148_v57, %v114_v56 }
 0x1a3   :  { %156 = vst.msk [vmem:[#allocation3] sm:$0xff] %vm26_vm0, %v154_v58 }
 0x1a4   :  { %v151_v60 = vpop.f32.mrf.mxu2 }
 0x1a5   :  { %v155_v61 = vadd.f32 %v151_v60, %v115_v59 }
 0x1a7   :  { %157 = vst.msk [vmem:[#allocation3 + $0x8] sm:$0xff] %vm26_vm0, %v155_v61 }
 0x1aa   :  { %v161_v62 = vld [vmem:[#allocation3] sm:$0xff] }
 0x1ab   :  { %163 = vst.msk [vmem:[#allocation4] sm:$0xff] %vm26_vm0, %v161_v62 }
 0x1ae   :  { %v162_v63 = vld [vmem:[#allocation3 + $0x8] sm:$0xff] }
 0x1af   :  { %164 = vst.msk [vmem:[#allocation4 + $0x8] sm:$0xff] %vm26_vm0, %v162_v63 }
 0x1b0   :  { %177 = dma.vmem_to_hbm [thread:$0]  %s170_s16, 256, %s172_s0, [#allocation5], %s238_s19, %s238_s19, %s239_s20  }
 0x1b1   :  { %234 = dma.done.wait [#allocation5], 256  }
 0x1b2   :  { %235 = vsyncadd [#allocation5], 4294967040 }
 0x1b3   :  { %182 = vsyncpa [#allocation5], 1 }

</bundles_post_ra>
